<compile_context>
chip_gen: v5e
topology: v5e:2x2
jax: 0.10.0
libtpu: 0.0.40
codegen_flags: <defaults>
</compile_context>

<pallas_src>
import functools

import jax
import jax.numpy as jnp
from jax.experimental import pallas as pl
from jax.experimental.pallas import tpu as pltpu


def _round_up(x: int, m: int) -> int:
    return ((x + m - 1) // m) * m


def _pick_batch_tile(batch: int) -> int:
    """Batch tile: multiple of 16 (bf16 rows pack 2/sublane), big enough to
    amortize per-step overhead, and >= 2 grid steps for large batches so the
    'parallel' axis can be split across v7x's two TensorCores."""
    b16 = _round_up(batch, 16)
    if b16 <= 256:
        return b16                               # tiny batch: single tile
    if b16 <= 1024:
        return _round_up((b16 + 1) // 2, 16)     # exactly 2 (balanced) tiles
    return 512                                   # large batch: 512-row tiles


# ---------------- fused Pallas kernel ----------------

def _fused_mlp_kernel(*refs, n_hidden: int, out_valid: int, out_padded: int,
                      apply_softmax: bool):
    # refs (n_hidden > 0): x, w_in, b_in, w_hid, b_hid, w_out, b_out, o
    # refs (n_hidden == 0): x, w_in, b_in, w_out, b_out, o
    #   x:     (TB, Din_p)            bf16
    #   w_in:  (Din_p, H_p)           bf16    b_in:  (1, H_p)          f32
    #   w_hid: (n_hidden, H_p, H_p)   bf16    b_hid: (n_hidden, 1, H_p) f32
    #   w_out: (H_p, Dout_p)          bf16    b_out: (1, Dout_p)        f32
    #   o:     (TB, Dout_p)           f32
    if n_hidden > 0:
        (x_ref, w_in_ref, b_in_ref, w_hid_ref, b_hid_ref,
         w_out_ref, b_out_ref, o_ref) = refs
    else:
        (x_ref, w_in_ref, b_in_ref, w_out_ref, b_out_ref, o_ref) = refs
        w_hid_ref = b_hid_ref = None

    # input layer: bf16 operands, f32 MXU accumulation
    h = jnp.dot(x_ref[...], w_in_ref[...], preferred_element_type=jnp.float32)
    h = jnp.maximum(h + b_in_ref[...], 0.0)

    # hidden layers: static unroll, activation stays in vregs (no VMEM scratch)
    for l in range(n_hidden):
        h = jnp.dot(h.astype(jnp.bfloat16), w_hid_ref[l],
                    preferred_element_type=jnp.float32)
        h = jnp.maximum(h + b_hid_ref[l], 0.0)

    # output layer
    y = jnp.dot(h.astype(jnp.bfloat16), w_out_ref[...],
                preferred_element_type=jnp.float32)
    y = y + b_out_ref[...]

    if apply_softmax:
        if out_valid < out_padded:
            # mask zero-padded logit columns (only emitted when padding exists)
            col = jax.lax.broadcasted_iota(jnp.int32, y.shape, 1)
            y = jnp.where(col < out_valid, y, -1e30)
        m = jnp.max(y, axis=1, keepdims=True)
        e = jnp.exp(y - m)
        y = e / jnp.sum(e, axis=1, keepdims=True)   # exact: rows sum to 1

    o_ref[...] = y.astype(o_ref.dtype)


# ---------------- parameter preparation (hoisted, one-time) ----------------

def prepare_params(params):
    """Pad to lane-dense (128) feature dims, stack hidden layers, cast weights
    to bf16 (biases stay f32).  Done once at model-build time, not per call."""
    w_in, b_in = params["input"]
    hidden = params["hidden"]
    w_out, b_out = params["output"]

    Din, H = w_in.shape
    Dout = w_out.shape[1]
    n_hidden = len(hidden)

    Din_p = _round_up(Din, 128)
    H_p = _round_up(H, 128)
    Dout_p = _round_up(Dout, 128)

    prep = {
        "dims": (Din, H, Dout, Din_p, H_p, Dout_p, n_hidden),
        "w_in": jnp.pad(w_in, ((0, Din_p - Din), (0, H_p - H))).astype(jnp.bfloat16),
        "b_in": jnp.pad(b_in, ((0, 0), (0, H_p - H))).astype(jnp.float32),
        "w_out": jnp.pad(w_out, ((0, H_p - H), (0, Dout_p - Dout))).astype(jnp.bfloat16),
        "b_out": jnp.pad(b_out, ((0, 0), (0, Dout_p - Dout))).astype(jnp.float32),
    }
    if n_hidden > 0:
        prep["w_hid"] = jnp.stack(
            [jnp.pad(w, ((0, H_p - H), (0, H_p - H))) for (w, _) in hidden]
        ).astype(jnp.bfloat16)
        prep["b_hid"] = jnp.stack(
            [jnp.pad(b, ((0, 0), (0, H_p - H))) for (_, b) in hidden]
        ).astype(jnp.float32)
    return prep


# ---------------- forward wrapper ----------------

def arima_nn_forward(prep, x, task):
    Din, H, Dout, Din_p, H_p, Dout_p, n_hidden = prep["dims"]
    B = x.shape[0]
    assert x.shape[1] == Din

    TB = _pick_batch_tile(B)
    B_p = _round_up(B, TB)
    grid = (B_p // TB,)

    x_p = jnp.pad(x.astype(jnp.bfloat16), ((0, B_p - B), (0, Din_p - Din)))

    apply_softmax = (task == "classification")
    kernel = functools.partial(
        _fused_mlp_kernel, n_hidden=n_hidden, out_valid=Dout,
        out_padded=Dout_p, apply_softmax=apply_softmax)

    # x is streamed over the batch grid; all weights/biases use constant
    # index_maps and stay VMEM-resident across grid steps.
    in_specs = [
        pl.BlockSpec((TB, Din_p), lambda i: (i, 0)),           # x
        pl.BlockSpec((Din_p, H_p), lambda i: (0, 0)),          # w_in
        pl.BlockSpec((1, H_p), lambda i: (0, 0)),              # b_in
    ]
    args = [x_p, prep["w_in"], prep["b_in"]]
    if n_hidden > 0:
        in_specs += [
            pl.BlockSpec((n_hidden, H_p, H_p), lambda i: (0, 0, 0)),  # w_hid
            pl.BlockSpec((n_hidden, 1, H_p), lambda i: (0, 0, 0)),    # b_hid
        ]
        args += [prep["w_hid"], prep["b_hid"]]
    in_specs += [
        pl.BlockSpec((H_p, Dout_p), lambda i: (0, 0)),         # w_out
        pl.BlockSpec((1, Dout_p), lambda i: (0, 0)),           # b_out
    ]
    args += [prep["w_out"], prep["b_out"]]

    # VMEM budget: resident weights (pipeline may double-buffer them) plus
    # double-buffered x / out tiles and slack; keep headroom under 64 MiB.
    weight_bytes = sum(int(prep[k].size) * prep[k].dtype.itemsize
                       for k in prep if k != "dims")
    io_bytes = 2 * (TB * Din_p * 2 + TB * Dout_p * 4)
    vmem_limit = int(min(100 << 20,
                         max(32 << 20, 2 * weight_bytes + io_bytes + (4 << 20))))

    flops = 2 * B_p * (Din_p * H_p + n_hidden * H_p * H_p + H_p * Dout_p)
    cost = pl.CostEstimate(
        flops=flops,
        transcendentals=(B_p * Dout_p) if apply_softmax else 0,
        bytes_accessed=weight_bytes + int(x_p.size) * 2 + B_p * Dout_p * 4,
    )

    out_p = pl.pallas_call(
        kernel,
        out_shape=jax.ShapeDtypeStruct((B_p, Dout_p), jnp.float32),
        grid_spec=pltpu.PrefetchScalarGridSpec(
            num_scalar_prefetch=0,
            grid=grid,
            in_specs=in_specs,
            out_specs=pl.BlockSpec((TB, Dout_p), lambda i: (i, 0)),
        ),
        compiler_params=pltpu.CompilerParams(
            dimension_semantics=("parallel",),   # batch axis -> both v7x TCs
            vmem_limit_bytes=vmem_limit,
        ),
        cost_estimate=cost,
    )(*args)

    return out_p[:B, :Dout]


# ---------------- params / reference ----------------

def init_params(key, n_layers, input_dim, hidden_dim, output_dim):
    """Deterministic synthetic init (shapes match the nn.Module's __init__).
    Weights stored as (in_features, out_features) == PyTorch W.T; biases (1, out)."""
    params = {}
    k = key

    def dense(k, din, dout):
        k, kw, kb = jax.random.split(k, 3)
        bound = 1.0 / jnp.sqrt(jnp.float32(din))
        w = jax.random.uniform(kw, (din, dout), jnp.float32, -bound, bound)
        b = jax.random.uniform(kb, (1, dout), jnp.float32, -bound, bound)
        return k, (w, b)

    k, params["input"] = dense(k, input_dim, hidden_dim)
    hidden = []
    for _ in range(n_layers - 1):
        k, wb = dense(k, hidden_dim, hidden_dim)
        hidden.append(wb)
    params["hidden"] = hidden
    k, params["output"] = dense(k, hidden_dim, output_dim)
    return params


def reference_forward(params, x, task):
    w, b = params["input"]
    x = jax.nn.relu(x @ w + b)
    for (w, b) in params["hidden"]:
        x = jax.nn.relu(x @ w + b)
    w, b = params["output"]
    x = x @ w + b
    if task == "classification":
        x = jax.nn.softmax(x, axis=1)
    return x


if __name__ == "__main__":
    # small shapes consistent with the module's forward (2-D (batch, input_dim))
    n_layers, input_dim, hidden_dim, output_dim = 3, 16, 32, 8
    batch = 8

    key = jax.random.PRNGKey(0)
    kp, kx = jax.random.split(key)
    params = init_params(kp, n_layers, input_dim, hidden_dim, output_dim)
    prep = prepare_params(params)          # one-time, hoisted out of the call path
    x = jax.random.normal(kx, (batch, input_dim), jnp.float32)

    for task in ("classification", "regression"):
        out = jax.block_until_ready(arima_nn_forward(prep, x, task))
        ref = reference_forward(params, x, task)
        assert out.shape == (batch, output_dim)
        # bf16 matmul operands (f32 accumulation) -> slightly looser tolerance
        assert jnp.allclose(out, ref, atol=4e-2, rtol=4e-2), f"mismatch ({task})"

    print("KERNEL_OK")
</pallas_src>

<mosaic_0001>
module attributes {stable_mosaic.version = 11 : i64} {
  func.func @_fused_mlp_kernel(%arg0: i32, %arg1: memref<16x128xbf16, #tpu.memory_space<vmem>>, %arg2: memref<128x128xbf16, #tpu.memory_space<vmem>>, %arg3: memref<1x128xf32, #tpu.memory_space<vmem>>, %arg4: memref<2x128x128xbf16, #tpu.memory_space<vmem>>, %arg5: memref<2x1x128xf32, #tpu.memory_space<vmem>>, %arg6: memref<128x128xbf16, #tpu.memory_space<vmem>>, %arg7: memref<1x128xf32, #tpu.memory_space<vmem>>, %arg8: memref<16x128xf32, #tpu.memory_space<vmem>>) attributes {dimension_semantics = [#tpu.dimension_semantics<parallel>], iteration_bounds = array<i64: 1>, scalar_prefetch = 0 : i64, scratch_operands = 0 : i64, tpu.core_type = #tpu.core_type<tc>, window_params = [{transform_indices = @transform_0, window_bounds = array<i64: 16, 128>}, {pipeline_mode = #tpu.pipeline_mode<synchronous>, transform_indices = @transform_1, window_bounds = array<i64: 128, 128>}, {pipeline_mode = #tpu.pipeline_mode<synchronous>, transform_indices = @transform_2, window_bounds = array<i64: 1, 128>}, {pipeline_mode = #tpu.pipeline_mode<synchronous>, transform_indices = @transform_3, window_bounds = array<i64: 2, 128, 128>}, {pipeline_mode = #tpu.pipeline_mode<synchronous>, transform_indices = @transform_4, window_bounds = array<i64: 2, 1, 128>}, {pipeline_mode = #tpu.pipeline_mode<synchronous>, transform_indices = @transform_5, window_bounds = array<i64: 128, 128>}, {pipeline_mode = #tpu.pipeline_mode<synchronous>, transform_indices = @transform_6, window_bounds = array<i64: 1, 128>}, {transform_indices = @transform_7, window_bounds = array<i64: 16, 128>}]} {
    %c0 = arith.constant 0 : index
    %c0_0 = arith.constant 0 : index
    %0 = vector.load %arg1[%c0, %c0_0] : memref<16x128xbf16, #tpu.memory_space<vmem>>, vector<16x128xbf16>
    %c0_1 = arith.constant 0 : index
    %c0_2 = arith.constant 0 : index
    %1 = vector.load %arg2[%c0_1, %c0_2] : memref<128x128xbf16, #tpu.memory_space<vmem>>, vector<128x128xbf16>
    %cst = arith.constant dense<0.000000e+00> : vector<16x128xf32>
    %2 = tpu.matmul %0, %1, %cst {dimension_numbers = #tpu.dot_dimension_numbers<[1], [0], [0], [1], [0, 0, 1, 1], [], []>} : vector<16x128xbf16>, vector<128x128xbf16>, vector<16x128xf32> -> vector<16x128xf32>
    %c0_3 = arith.constant 0 : index
    %c0_4 = arith.constant 0 : index
    %3 = vector.load %arg3[%c0_3, %c0_4] : memref<1x128xf32, #tpu.memory_space<vmem>>, vector<1x128xf32>
    %4 = vector.broadcast %3 : vector<1x128xf32> to vector<16x128xf32>
    %5 = arith.addf %2, %4 : vector<16x128xf32>
    %cst_5 = arith.constant 0.000000e+00 : f32
    %6 = vector.broadcast %cst_5 : f32 to vector<16x128xf32>
    %7 = arith.maximumf %5, %6 : vector<16x128xf32>
    %8 = arith.truncf %7 : vector<16x128xf32> to vector<16x128xbf16>
    %c0_6 = arith.constant 0 : index
    %c0_7 = arith.constant 0 : index
    %c0_8 = arith.constant 0 : index
    %9 = vector.load %arg4[%c0_6, %c0_7, %c0_8] : memref<2x128x128xbf16, #tpu.memory_space<vmem>>, vector<1x128x128xbf16>
    %10 = vector.shape_cast %9 : vector<1x128x128xbf16> to vector<128x128xbf16>
    %cst_9 = arith.constant dense<0.000000e+00> : vector<16x128xf32>
    %11 = tpu.matmul %8, %10, %cst_9 {dimension_numbers = #tpu.dot_dimension_numbers<[1], [0], [0], [1], [0, 0, 1, 1], [], []>} : vector<16x128xbf16>, vector<128x128xbf16>, vector<16x128xf32> -> vector<16x128xf32>
    %c0_10 = arith.constant 0 : index
    %c0_11 = arith.constant 0 : index
    %c0_12 = arith.constant 0 : index
    %12 = vector.load %arg5[%c0_10, %c0_11, %c0_12] : memref<2x1x128xf32, #tpu.memory_space<vmem>>, vector<1x1x128xf32>
    %13 = vector.shape_cast %12 : vector<1x1x128xf32> to vector<1x128xf32>
    %14 = vector.broadcast %13 : vector<1x128xf32> to vector<16x128xf32>
    %15 = arith.addf %11, %14 : vector<16x128xf32>
    %cst_13 = arith.constant 0.000000e+00 : f32
    %16 = vector.broadcast %cst_13 : f32 to vector<16x128xf32>
    %17 = arith.maximumf %15, %16 : vector<16x128xf32>
    %18 = arith.truncf %17 : vector<16x128xf32> to vector<16x128xbf16>
    %c1 = arith.constant 1 : index
    %c0_14 = arith.constant 0 : index
    %c0_15 = arith.constant 0 : index
    %19 = vector.load %arg4[%c1, %c0_14, %c0_15] : memref<2x128x128xbf16, #tpu.memory_space<vmem>>, vector<1x128x128xbf16>
    %20 = vector.shape_cast %19 : vector<1x128x128xbf16> to vector<128x128xbf16>
    %cst_16 = arith.constant dense<0.000000e+00> : vector<16x128xf32>
    %21 = tpu.matmul %18, %20, %cst_16 {dimension_numbers = #tpu.dot_dimension_numbers<[1], [0], [0], [1], [0, 0, 1, 1], [], []>} : vector<16x128xbf16>, vector<128x128xbf16>, vector<16x128xf32> -> vector<16x128xf32>
    %c1_17 = arith.constant 1 : index
    %c0_18 = arith.constant 0 : index
    %c0_19 = arith.constant 0 : index
    %22 = vector.load %arg5[%c1_17, %c0_18, %c0_19] : memref<2x1x128xf32, #tpu.memory_space<vmem>>, vector<1x1x128xf32>
    %23 = vector.shape_cast %22 : vector<1x1x128xf32> to vector<1x128xf32>
    %24 = vector.broadcast %23 : vector<1x128xf32> to vector<16x128xf32>
    %25 = arith.addf %21, %24 : vector<16x128xf32>
    %cst_20 = arith.constant 0.000000e+00 : f32
    %26 = vector.broadcast %cst_20 : f32 to vector<16x128xf32>
    %27 = arith.maximumf %25, %26 : vector<16x128xf32>
    %28 = arith.truncf %27 : vector<16x128xf32> to vector<16x128xbf16>
    %c0_21 = arith.constant 0 : index
    %c0_22 = arith.constant 0 : index
    %29 = vector.load %arg6[%c0_21, %c0_22] : memref<128x128xbf16, #tpu.memory_space<vmem>>, vector<128x128xbf16>
    %cst_23 = arith.constant dense<0.000000e+00> : vector<16x128xf32>
    %30 = tpu.matmul %28, %29, %cst_23 {dimension_numbers = #tpu.dot_dimension_numbers<[1], [0], [0], [1], [0, 0, 1, 1], [], []>} : vector<16x128xbf16>, vector<128x128xbf16>, vector<16x128xf32> -> vector<16x128xf32>
    %c0_24 = arith.constant 0 : index
    %c0_25 = arith.constant 0 : index
    %31 = vector.load %arg7[%c0_24, %c0_25] : memref<1x128xf32, #tpu.memory_space<vmem>>, vector<1x128xf32>
    %32 = vector.broadcast %31 : vector<1x128xf32> to vector<16x128xf32>
    %33 = arith.addf %30, %32 : vector<16x128xf32>
    %34 = tpu.iota {dimensions = array<i32: 1>} : vector<16x128xi32>
    %c8_i32 = arith.constant 8 : i32
    %35 = vector.broadcast %c8_i32 : i32 to vector<16x128xi32>
    %36 = arith.cmpi slt, %34, %35 : vector<16x128xi32>
    %cst_26 = arith.constant -1.000000e+30 : f32
    %37 = vector.broadcast %cst_26 : f32 to vector<16x128xf32>
    %38 = arith.select %36, %33, %37 : vector<16x128xi1>, vector<16x128xf32>
    %cst_27 = arith.constant dense<0xFF800000> : vector<16xf32>
    %39 = vector.multi_reduction <maximumf>, %38, %cst_27 [1] : vector<16x128xf32> to vector<16xf32>
    %40 = vector.shape_cast %39 : vector<16xf32> to vector<16x1xf32>
    %41 = vector.broadcast %40 : vector<16x1xf32> to vector<16x128xf32>
    %42 = arith.subf %38, %41 : vector<16x128xf32>
    %43 = math.exp %42 : vector<16x128xf32>
    %cst_28 = arith.constant dense<0.000000e+00> : vector<16xf32>
    %44 = vector.multi_reduction <add>, %43, %cst_28 [1] : vector<16x128xf32> to vector<16xf32>
    %45 = vector.shape_cast %44 : vector<16xf32> to vector<16x1xf32>
    %46 = vector.broadcast %45 : vector<16x1xf32> to vector<16x128xf32>
    %47 = arith.divf %43, %46 : vector<16x128xf32>
    %c0_29 = arith.constant 0 : index
    %c0_30 = arith.constant 0 : index
    %48 = vector.load %arg8[%c0_29, %c0_30] : memref<16x128xf32, #tpu.memory_space<vmem>>, vector<16x128xf32>
    tpu.vector_store %arg8[%c0_29, %c0_30], %47 {strides = array<i32>} : memref<16x128xf32, #tpu.memory_space<vmem>>, vector<16x128xf32>,
    return
  }
  func.func @transform_0(%arg0: i32) -> (i32, i32) {
    %c0_i32 = arith.constant 0 : i32
    %c0_i32_0 = arith.constant 0 : i32
    return %arg0, %c0_i32 : i32, i32
  }
  func.func @transform_1(%arg0: i32) -> (i32, i32) {
    %c0_i32 = arith.constant 0 : i32
    %c0_i32_0 = arith.constant 0 : i32
    %c0_i32_1 = arith.constant 0 : i32
    return %c0_i32, %c0_i32_0 : i32, i32
  }
  func.func @transform_2(%arg0: i32) -> (i32, i32) {
    %c0_i32 = arith.constant 0 : i32
    %c0_i32_0 = arith.constant 0 : i32
    %c0_i32_1 = arith.constant 0 : i32
    return %c0_i32, %c0_i32_0 : i32, i32
  }
  func.func @transform_3(%arg0: i32) -> (i32, i32, i32) {
    %c0_i32 = arith.constant 0 : i32
    %c0_i32_0 = arith.constant 0 : i32
    %c0_i32_1 = arith.constant 0 : i32
    %c0_i32_2 = arith.constant 0 : i32
    return %c0_i32, %c0_i32_0, %c0_i32_1 : i32, i32, i32
  }
  func.func @transform_4(%arg0: i32) -> (i32, i32, i32) {
    %c0_i32 = arith.constant 0 : i32
    %c0_i32_0 = arith.constant 0 : i32
    %c0_i32_1 = arith.constant 0 : i32
    %c0_i32_2 = arith.constant 0 : i32
    return %c0_i32, %c0_i32_0, %c0_i32_1 : i32, i32, i32
  }
  func.func @transform_5(%arg0: i32) -> (i32, i32) {
    %c0_i32 = arith.constant 0 : i32
    %c0_i32_0 = arith.constant 0 : i32
    %c0_i32_1 = arith.constant 0 : i32
    return %c0_i32, %c0_i32_0 : i32, i32
  }
  func.func @transform_6(%arg0: i32) -> (i32, i32) {
    %c0_i32 = arith.constant 0 : i32
    %c0_i32_0 = arith.constant 0 : i32
    %c0_i32_1 = arith.constant 0 : i32
    return %c0_i32, %c0_i32_0 : i32, i32
  }
  func.func @transform_7(%arg0: i32) -> (i32, i32) {
    %c0_i32 = arith.constant 0 : i32
    %c0_i32_0 = arith.constant 0 : i32
    return %arg0, %c0_i32 : i32, i32
  }
}

</mosaic_0001>

<bundles_post_ra>
// kernel: tpu_custom_call.1
= control target key start
LH: loop header
LB: loop body
LE: loop exit
PB: predicated region body
PF: predicated region fallthrough
CT: control target
= control target key end

     0   :  { %12 = vsyncpa [#allocation3], 0  ;;  %s900_s0 = inlined_call_operand.hbm [shape: bf16[16,128], index: 0, kind: input, shape index: {}]   ;;  %s901_s1 = inlined_call_operand.hbm [shape: bf16[128,128], index: 1, kind: input, shape index: {}]   ;;  %s902_s2 = inlined_call_operand.vmem [shape: f32[1,128], index: 2, kind: input, shape index: {}]   ;;  %s903_s3 = inlined_call_operand.hbm [shape: bf16[2,128,128], index: 3, kind: input, shape index: {}]   ;;  %s904_s4 = inlined_call_operand.vmem [shape: f32[2,1,128], index: 4, kind: input, shape index: {}]   ;;  %s905_s5 = inlined_call_operand.hbm [shape: bf16[128,128], index: 5, kind: input, shape index: {}]   ;;  %s906_s6 = inlined_call_operand.vmem [shape: f32[1,128], index: 6, kind: input, shape index: {}]   ;;  %s907_s7 = inlined_call_operand.hbm [shape: f32[16,128], index: 7, kind: output, shape index: {}]  }
   0x1   :  { %13 = vsyncpa [#allocation6], 0 }
   0x2   :  { %14 = vsyncpa [#allocation9], 0 }
   0x3   :  { %15 = vsyncpa [#allocation4], 0  ;;  %s33_s26 = sshll.u32 %s901_s1, 4  ;;  %s824_s27 = smov [#allocation5]   ;;  %s34_s26 = int_to_ptr.hbm [resolvable:$true] %s33_s26 }
   0x4   :  { %s35_s28 = sshll.u32 %s824_s27, 4  ;;  %s20_s8 = sshll.u32 %s900_s0, 4  ;;  %s36_s28 = int_to_ptr.vmem [resolvable:$true] %s35_s28  ;;  %s21_s8 = int_to_ptr.hbm [resolvable:$true] %s20_s8 }
   0x5   :  { %s825_s9 = smov 64   ;;  %s826_s10 = smov 4  }
   0x6   :  { %41 = dma.hbm_to_vmem [thread:$0]  %s34_s26, 1024, %s36_s28, [#allocation6], %s825_s9, %s825_s9, %s826_s10  }
   0x7   :  { %s827_s11 = smov [#allocation2]   ;;  %s48_s15 = sshll.u32 %s903_s3, 4  ;;  %s49_s15 = int_to_ptr.hbm [resolvable:$true] %s48_s15 }
   0x8   :  { %s22_s12 = sshll.u32 %s827_s11, 4  ;;  %s63_s17 = sshll.u32 %s905_s5, 4  ;;  %s23_s12 = int_to_ptr.vmem [resolvable:$true] %s22_s12  ;;  %s64_s17 = int_to_ptr.hbm [resolvable:$true] %s63_s17 }
   0x9   :  { %28 = dma.hbm_to_vmem [thread:$0]  %s21_s8, 128, %s23_s12, [#allocation3], %s825_s9, %s825_s9, %s826_s10  }
   0xa   :  { %s828_s18 = smov [#allocation7]   ;;  %s829_s0 = smov [#allocation8]  }
   0xb   :  { %s50_s19 = sshll.u32 %s828_s18, 4  ;;  %s65_s20 = sshll.u32 %s829_s0, 4  ;;  %s51_s19 = int_to_ptr.vmem [resolvable:$true] %s50_s19  ;;  %s66_s20 = int_to_ptr.vmem [resolvable:$true] %s65_s20 }
   0xc   :  { %56 = dma.hbm_to_vmem [thread:$0]  %s49_s15, 2048, %s51_s19, [#allocation6], %s825_s9, %s825_s9, %s826_s10  }
   0xd   :  { %71 = dma.hbm_to_vmem [thread:$0]  %s64_s17, 1024, %s66_s20, [#allocation9], %s825_s9, %s825_s9, %s826_s10  }
   0xe   :  { %816 = dma.done.wait [#allocation3], 128  }
   0xf   :  { %817 = vsyncadd [#allocation3], 4294967168 }
  0x10   :  { %818 = dma.done.wait [#allocation6], 3072  }
  0x11   :  { %819 = vsyncadd [#allocation6], 4294964224 }
  0x12   :  { %820 = dma.done.wait [#allocation9], 1024  }
  0x13   :  { %821 = vsyncadd [#allocation9], 4294966272  ;;  %v650_v0 = vld [vmem:[#allocation5 + $0x38] sm:$0xff]  ;;  %v649_v1 = vld [vmem:[#allocation5 + $0x30] sm:$0xff]  ;;  %v437_v57 = vlaneseq  ;;  %s494_s28 = sshll.u32 %s907_s7, 4  ;;  %s831_s29 = smov 128   ;;  %s495_s28 = int_to_ptr.hbm [resolvable:$true] %s494_s28 }
  0x14   :  { %166 = vmatpush.bf16.msra.mxu0 %v650_v0  ;;  %v658_v2 = vld [vmem:[#allocation7 + $0x38] sm:$0xff]  ;;  %v657_v3 = vld [vmem:[#allocation7 + $0x30] sm:$0xff]  ;;  %v648_v4 = vld [vmem:[#allocation5 + $0x28] sm:$0xff]  ;;  %s832_s30 = smov 8  }
  0x15   :  { %251 = vmatpush.bf16.msra.mxu1 %v658_v2  ;;  %v656_v5 = vld [vmem:[#allocation7 + $0x28] sm:$0xff]  ;;  %v647_v6 = vld [vmem:[#allocation5 + $0x20] sm:$0xff]  ;;  %v646_v8 = vld [vmem:[#allocation5 + $0x18] sm:$0xff]  ;;  %v438_v58 = vand.u32 127, %v437_v57 }
  0x16   :  { %v655_v7 = vld [vmem:[#allocation7 + $0x20] sm:$0xff]  ;;  %v645_v9 = vld [vmem:[#allocation5 + $0x10] sm:$0xff]  ;;  %v644_v10 = vld [vmem:[#allocation5 + $0x8] sm:$0xff] }
  0x17   :  { %v643_v11 = vld [vmem:[#allocation5] sm:$0xff]  ;;  %v642_v12 = vld [vmem:[#allocation2] sm:$0xff]  ;;  %v653_v14 = vld [vmem:[#allocation7 + $0x10] sm:$0xff]  ;;  %vm439_vm0 = vcmp.lt.s32.totalorder %v438_v58, 8 }
  0x18   :  { %167 = vmatpush.bf16.msra.mxu0 %v649_v1  ;;  %v654_v13 = vld [vmem:[#allocation7 + $0x18] sm:$0xff]  ;;  %v652_v15 = vld [vmem:[#allocation7 + $0x8] sm:$0xff]  ;;  %v651_v16 = vld [vmem:[#allocation7] sm:$0xff] }
  0x19   :  { %252 = vmatpush.bf16.msra.mxu1 %v657_v3  ;;  %v666_v17 = vld [vmem:[#allocation7 + $0x78] sm:$0xff]  ;;  %v665_v18 = vld [vmem:[#allocation7 + $0x70] sm:$0xff]  ;;  %v664_v19 = vld [vmem:[#allocation7 + $0x68] sm:$0xff] }
  0x1a   :  { %338 = vmatpush.bf16.msra.mxu2 %v666_v17  ;;  %v663_v20 = vld [vmem:[#allocation7 + $0x60] sm:$0xff]  ;;  %v684_v22 = vld [vmem:[%s902_s2] ss:$0 sm:$0xff]  ;;  %v661_v30 = vld [vmem:[#allocation7 + $0x50] sm:$0xff] }
  0x1b   :  { %v662_v29 = vld [vmem:[#allocation7 + $0x58] sm:$0xff]  ;;  %v660_v31 = vld [vmem:[#allocation7 + $0x48] sm:$0xff]  ;;  %v659_v32 = vld [vmem:[#allocation7 + $0x40] sm:$0xff] }
  0x1c   :  { %168 = vmatpush.bf16.msra.mxu0 %v648_v4  ;;  %v674_v33 = vld [vmem:[#allocation8 + $0x38] sm:$0xff]  ;;  %v673_v34 = vld [vmem:[#allocation8 + $0x30] sm:$0xff]  ;;  %v672_v35 = vld [vmem:[#allocation8 + $0x28] sm:$0xff] }
  0x1d   :  { %253 = vmatpush.bf16.msra.mxu1 %v656_v5  ;;  %423 = vmatpush.bf16.msra.mxu3 %v674_v33  ;;  %v671_v36 = vld [vmem:[#allocation8 + $0x20] sm:$0xff]  ;;  %v685_v38 = vld [vmem:[%s904_s4] ss:$0 sm:$0xff]  ;;  %v669_v46 = vld [vmem:[#allocation8 + $0x10] sm:$0xff] }
  0x1e   :  { %339 = vmatpush.bf16.msra.mxu2 %v665_v18  ;;  %v670_v45 = vld [vmem:[#allocation8 + $0x18] sm:$0xff]  ;;  %v668_v47 = vld [vmem:[#allocation8 + $0x8] sm:$0xff]  ;;  %v667_v48 = vld [vmem:[#allocation8] sm:$0xff] }
  0x1f   :  { %v686_v50 = vld [vmem:[%s904_s4 + $0x1] ss:$0 sm:$0xff]  ;;  %v687_v59 = vld [vmem:[%s906_s6] ss:$0 sm:$0xff]  ;;  %s830_s4 = smov [#allocation10]  }
  0x20   :  { %169 = vmatpush.bf16.msra.mxu0 %v647_v6  ;;  %s492_s6 = sshll.u32 %s830_s4, 4  ;;  %s493_s6 = int_to_ptr.vmem [resolvable:$true] %s492_s6 }
  0x21   :  { %254 = vmatpush.bf16.msra.mxu1 %v655_v7  ;;  %424 = vmatpush.bf16.msra.mxu3 %v673_v34 }
  0x22   :  { %340 = vmatpush.bf16.msra.mxu2 %v664_v19 }
  0x24   :  { %170 = vmatpush.bf16.msra.mxu0 %v646_v8 }
  0x25   :  { %255 = vmatpush.bf16.msra.mxu1 %v654_v13  ;;  %425 = vmatpush.bf16.msra.mxu3 %v672_v35 }
  0x26   :  { %341 = vmatpush.bf16.msra.mxu2 %v663_v20 }
  0x28   :  { %171 = vmatpush.bf16.msra.mxu0 %v645_v9 }
  0x29   :  { %256 = vmatpush.bf16.msra.mxu1 %v653_v14  ;;  %426 = vmatpush.bf16.msra.mxu3 %v671_v36 }
  0x2a   :  { %342 = vmatpush.bf16.msra.mxu2 %v662_v29 }
  0x2c   :  { %172 = vmatpush.bf16.msra.mxu0 %v644_v10 }
  0x2d   :  { %257 = vmatpush.bf16.msra.mxu1 %v652_v15  ;;  %427 = vmatpush.bf16.msra.mxu3 %v670_v45 }
  0x2e   :  { %343 = vmatpush.bf16.msra.mxu2 %v661_v30 }
  0x30   :  { %173 = vmatpush.bf16.msra.mxu0 %v643_v11 }
  0x31   :  { %258 = vmatpush.bf16.msra.mxu1 %v651_v16  ;;  %428 = vmatpush.bf16.msra.mxu3 %v669_v46 }
  0x32   :  { %344 = vmatpush.bf16.msra.mxu2 %v660_v31 }
  0x33   :  { %174 = vmatmul.bf16.vlgmr.msra.gmra.mxu0 %v642_v12 }
  0x35   :  { %429 = vmatpush.bf16.msra.mxu3 %v668_v47 }
  0x36   :  { %345 = vmatpush.bf16.msra.mxu2 %v659_v32 }
  0x39   :  { %430 = vmatpush.bf16.msra.mxu3 %v667_v48 }
  0xb0   :  { %v175_v21 = vpop.f32.mrf.mxu0 }
  0xb1   :  { %v176_v23 = vadd.f32 %v684_v22, %v175_v21 }
  0xb3   :  { %v180_v26 = vmax.f32 %v176_v23, 0.0 }
  0xb8   :  { %v177_v24 = vpop.f32.mrf.mxu0 }
  0xb9   :  { %v178_v25 = vadd.f32 %v684_v22, %v177_v24 }
  0xbb   :  { %v181_v27 = vmax.f32 %v178_v25, 0.0 }
  0xbd   :  { %v182_v28 = vpack.c.bf16 %v181_v27, %v180_v26 }
  0xbf   :  { %259 = vmatmul.bf16.vlgmr.msra.gmra.mxu1 %v182_v28 }
 0x13c   :  { %v260_v37 = vpop.f32.mrf.mxu1 }
 0x13d   :  { %v261_v39 = vadd.f32 %v685_v38, %v260_v37 }
 0x13f   :  { %v265_v42 = vmax.f32 %v261_v39, 0.0 }
 0x144   :  { %v262_v40 = vpop.f32.mrf.mxu1 }
 0x145   :  { %v263_v41 = vadd.f32 %v685_v38, %v262_v40 }
 0x147   :  { %v266_v43 = vmax.f32 %v263_v41, 0.0 }
 0x149   :  { %v267_v44 = vpack.c.bf16 %v266_v43, %v265_v42 }
 0x14b   :  { %346 = vmatmul.bf16.vlgmr.msra.gmra.mxu2 %v267_v44 }
 0x1ce   :  { %v347_v49 = vpop.f32.mrf.mxu2 }
 0x1cf   :  { %v348_v51 = vadd.f32 %v686_v50, %v347_v49 }
 0x1d1   :  { %v352_v54 = vmax.f32 %v348_v51, 0.0 }
 0x1d6   :  { %v349_v52 = vpop.f32.mrf.mxu2 }
 0x1d7   :  { %v350_v53 = vadd.f32 %v686_v50, %v349_v52 }
 0x1d9   :  { %v353_v55 = vmax.f32 %v350_v53, 0.0 }
 0x1db   :  { %v354_v56 = vpack.c.bf16 %v353_v55, %v352_v54 }
 0x1dd   :  { %431 = vmatmul.bf16.vlgmr.msra.gmra.mxu3 %v354_v56 }
 0x260   :  { %v432_v60 = vpop.f32.mrf.mxu3 }
 0x261   :  { %v433_v61 = vadd.f32 %v687_v59, %v432_v60 }
 0x263   :  { %v440_v62 = vsel %vm439_vm0, %v433_v61, -1e+30 }
 0x264   :  { %442 = vmax.xlane.f32.xlu0 %v440_v62 }
 0x268   :  { %v434_v63 = vpop.f32.mrf.mxu3 }
 0x269   :  { %v435_v0 = vadd.f32 %v687_v59, %v434_v63 }
 0x26b   :  { %v441_v1 = vsel %vm439_vm0, %v435_v0, -1e+30 }
 0x26c   :  { %444 = vmax.xlane.f32.xlu0 %v441_v1 }
 0x2d7   :  { %v443_v2 = vpop.xlane.xlu0 %442 }
 0x2d8   :  { %v446_v3 = vsub.f32 %v440_v62, %v443_v2 }
 0x2da   :  { %v448_v4 = vmul.f32 1.442695, %v446_v3 }
 0x2dc   :  { %688 = vpow2.f32 %v448_v4 }
 0x2df   :  { %v445_v5 = vpop.xlane.xlu0 %444 }
 0x2e0   :  { %v447_v6 = vsub.f32 %v441_v1, %v445_v5 }
 0x2e2   :  { %v689_v7 = vpop.eup %688  ;;  %v450_v8 = vmul.f32 1.442695, %v447_v6 }
 0x2e3   :  { %452 = vadd.xlane.f32.xlu1 %v689_v7 }
 0x2e4   :  { %690 = vpow2.f32 %v450_v8 }
 0x2ea   :  { %v691_v9 = vpop.eup %690 }
 0x2eb   :  { %454 = vadd.xlane.f32.xlu1 %v691_v9 }
 0x356   :  { %v453_v10 = vpop.xlane.xlu1 %452 }
 0x357   :  { %692 = vrcp.f32 %v453_v10  ;;  %v467_v15 = vand.u32 2147483648, %v453_v10  ;;  %v465_v17 = vand.u32 2147483647, %v453_v10  ;;  %vm461_vm2 = vweird.f32 %v453_v10 }
 0x359   :  { %v468_v20 = vor.u32 1.1754944e-38, %v467_v15  ;;  %vm466_vm4 = vcmp.eq.f32.partialorder %v465_v17, 8.507059e+37 }
 0x35d   :  { %v693_v11 = vpop.eup %692 }
 0x35e   :  { %v457_v12 = vmul.f32 %v693_v11, %v453_v10  ;;  %v455_v13 = vpop.xlane.xlu1 %454  ;;  %vm462_vm1 = vweird.f32 %v693_v11 }
 0x35f   :  { %694 = vrcp.f32 %v455_v13  ;;  %vm463_vm3 = vmor %vm461_vm2, %vm462_vm1  ;;  %v482_v26 = vand.u32 2147483648, %v455_v13  ;;  %v480_v28 = vand.u32 2147483647, %v455_v13  ;;  %vm476_vm6 = vweird.f32 %v455_v13 }
 0x360   :  { %v458_v14 = vsub.f32 1.0, %v457_v12 }
 0x361   :  { %v483_v30 = vor.u32 1.1754944e-38, %v482_v26  ;;  %vm481_vm8 = vcmp.eq.f32.partialorder %v480_v28, 8.507059e+37 }
 0x362   :  { %v459_v16 = vmul.f32 %v693_v11, %v458_v14 }
 0x364   :  { %v460_v18 = vadd.f32 %v693_v11, %v459_v16 }
 0x365   :  { %v695_v19 = vpop.eup %694 }
 0x366   :  { %v464_v21 = vsel %vm463_vm3, %v693_v11, %v460_v18  ;;  %v472_v22 = vmul.f32 %v695_v19, %v455_v13  ;;  %vm477_vm5 = vweird.f32 %v695_v19 }
 0x367   :  { %v469_v23 = vsel %vm466_vm4, %v468_v20, %v464_v21  ;;  %vm478_vm7 = vmor %vm476_vm6, %vm477_vm5 }
 0x368   :  { %v470_v24 = vmul.f32 %v689_v7, %v469_v23  ;;  %v473_v25 = vsub.f32 1.0, %v472_v22 }
 0x36a   :  { %486 = vst [vmem:[#allocation10] sm:$0xff] %v470_v24  ;;  %v474_v27 = vmul.f32 %v695_v19, %v473_v25 }
 0x36c   :  { %v475_v29 = vadd.f32 %v695_v19, %v474_v27 }
 0x36e   :  { %v479_v31 = vsel %vm478_vm7, %v695_v19, %v475_v29 }
 0x36f   :  { %v484_v32 = vsel %vm481_vm8, %v483_v30, %v479_v31 }
 0x370   :  { %v485_v33 = vmul.f32 %v691_v9, %v484_v32 }
 0x372   :  { %487 = vst [vmem:[#allocation10 + $0x8] sm:$0xff] %v485_v33 }
 0x373   :  { %500 = dma.vmem_to_hbm [thread:$0]  %s493_s6, 256, %s495_s28, [#allocation4], %s831_s29, %s831_s29, %s832_s30  }
 0x374   :  { %822 = dma.done.wait [#allocation4], 256  }
 0x375   :  { %823 = vsyncadd [#allocation4], 4294967040 }
 0x376   :  { %505 = vsyncpa [#allocation3], 1 }
 0x377   :  { %506 = vsyncpa [#allocation6], 1 }
 0x378   :  { %507 = vsyncpa [#allocation9], 1 }
 0x379   :  { %508 = vsyncpa [#allocation4], 1 }

</bundles_post_ra>
